<compile_context>
chip_gen: v7x
topology: tpu7x:2x2x1
jax: 0.10.0
libtpu: 0.0.40
codegen_flags: <defaults>
</compile_context>

<pallas_src>
import jax
import jax.numpy as jnp
from jax import lax
from jax.experimental import pallas as pl
from jax.experimental.pallas import tpu as pltpu


# ---------------------------------------------------------------------------
# Kernels
# ---------------------------------------------------------------------------
def _loras_nt_acc_kernel(x_ref, w_ref, b_ref, o_ref, acc_ref):
    # x_ref: (tm, tk), w_ref: (tn, tk) [NT layout], b_ref: (1, tn) f32,
    # o_ref: (tm, tn), acc_ref: (tm, tn) f32 scratch (persists across K steps).
    k = pl.program_id(2)

    @pl.when(k == 0)
    def _():
        acc_ref[...] = jnp.zeros_like(acc_ref)

    acc_ref[...] += lax.dot_general(
        x_ref[...], w_ref[...],
        dimension_numbers=(((1,), (1,)), ((), ())),
        preferred_element_type=jnp.float32)

    @pl.when(k == pl.num_programs(2) - 1)
    def _():
        o_ref[...] = (acc_ref[...] + b_ref[...]).astype(o_ref.dtype)


def _loras_nt_single_kernel(x_ref, w_ref, b_ref, o_ref):
    # Single-K-step fast path: no accumulator scratch, write result directly.
    acc = lax.dot_general(
        x_ref[...], w_ref[...],
        dimension_numbers=(((1,), (1,)), ((), ())),
        preferred_element_type=jnp.float32)
    o_ref[...] = (acc + b_ref[...]).astype(o_ref.dtype)


# ---------------------------------------------------------------------------
# Tiling helpers
# ---------------------------------------------------------------------------
def _round_up(v, m):
    return (v + m - 1) // m * m


def _pick_tile(dim, preferred, align):
    """Pad `dim` only to `align`; pick a tile (align-multiple, <= preferred)
    that divides the padded size with minimal extra padding.
    Returns (tile, padded_dim) with padded_dim % tile == 0."""
    aligned = _round_up(dim, align)
    if aligned <= preferred:
        return aligned, aligned
    best_key, best_t, best_p = None, align, _round_up(aligned, align)
    t = (preferred // align) * align
    min_t = max(align, (preferred // 4 // align) * align)
    while t >= min_t:
        padded = _round_up(aligned, t)
        key = (padded, -t)              # minimize padding, then maximize tile
        if best_key is None or key < best_key:
            best_key, best_t, best_p = key, t, padded
        t -= align
    return best_t, best_p


# ---------------------------------------------------------------------------
# Weight fusion (hoistable / cacheable across calls)
# ---------------------------------------------------------------------------
def fuse_loras_weight(right_w, left_w, sparse_w=None, *,
                      compute_dtype=jnp.bfloat16):
    """W_fused = Wl @ Wr (+ Ws) in (out, in) layout — no transposes.
    Fusion is done in f32, then cast once to the GEMM compute dtype."""
    w = jnp.dot(left_w.astype(jnp.float32), right_w.astype(jnp.float32),
                precision=lax.Precision.HIGHEST)            # (out, in)
    if sparse_w is not None:                                 # has_sparse
        w = w + sparse_w.astype(jnp.float32)
    return w.astype(compute_dtype)


# ---------------------------------------------------------------------------
# Forward
# ---------------------------------------------------------------------------
def linear_loras_forward(x, right_w=None, left_w=None, sparse_w=None, bias=None,
                         *, fused_w=None, tm=512, tn=512, tk=1024,
                         compute_dtype=jnp.bfloat16):
    """x: (B, L, in). Either pass (right_w, left_w[, sparse_w]) or a pre-fused
    `fused_w` of shape (out, in) from fuse_loras_weight(). Returns (B, L, out)."""
    B, L, in_feature = x.shape
    M = B * L
    out_dtype = x.dtype
    cdt = jnp.dtype(compute_dtype)

    if fused_w is None:
        fused_w = fuse_loras_weight(right_w, left_w, sparse_w,
                                    compute_dtype=cdt)       # (out, in)
    else:
        fused_w = fused_w.astype(cdt)
    out_feature = fused_w.shape[0]

    if bias is None:                                         # has_bias=False
        bias = jnp.zeros((out_feature,), jnp.float32)
    b2d = bias.astype(jnp.float32).reshape(1, out_feature)

    x2d = x.reshape(M, in_feature).astype(cdt)

    # ---- tile selection: pad only to (pack, 128), tile divides padded dim ----
    m_align = {1: 32, 2: 16, 4: 8}.get(cdt.itemsize, 8)      # dtype packing
    tm, Mp = _pick_tile(M, tm, m_align)
    tn, Np = _pick_tile(out_feature, tn, 128)
    tk, Kp = _pick_tile(in_feature, tk, 128)

    # Megacore: if the whole (M, N) output is one block, split it so both
    # TensorCores (v7x) get a parallel block.
    if (Mp // tm) == 1 and (Np // tn) == 1:
        if tm % (2 * m_align) == 0 and tm >= 4 * m_align:
            tm //= 2
        elif tn % 256 == 0:
            tn //= 2

    x_p = jnp.pad(x2d, ((0, Mp - M), (0, Kp - in_feature)))
    w_p = jnp.pad(fused_w, ((0, Np - out_feature), (0, Kp - in_feature)))
    b_p = jnp.pad(b2d, ((0, 0), (0, Np - out_feature)))

    mb, nb, kb = Mp // tm, Np // tn, Kp // tk
    grid = (mb, nb, kb)

    in_isz = cdt.itemsize
    out_isz = jnp.dtype(out_dtype).itemsize
    cost = pl.CostEstimate(
        flops=2 * Mp * Kp * Np,
        transcendentals=0,
        bytes_accessed=(Mp * Kp * in_isz * nb          # x re-read per N block
                        + Np * Kp * in_isz * mb        # w re-read per M block
                        + Mp * Np * out_isz            # output written once
                        + Np * 4 * mb),                # bias
    )

    # Per-step VMEM footprint (double-buffered streams + acc + output).
    vmem_est = (2 * tm * tk * in_isz + 2 * tn * tk * in_isz + 2 * tn * 4
                + (0 if kb == 1 else tm * tn * 4) + 2 * tm * tn * out_isz)
    cp_kwargs = dict(dimension_semantics=("parallel", "parallel", "arbitrary"))
    if vmem_est > 12 * 1024 * 1024:
        # Only raise the scoped limit when a custom tile config needs it; cap at
        # v7x's 64 MiB physical VMEM.
        cp_kwargs["vmem_limit_bytes"] = min(int(vmem_est * 3 // 2),
                                            64 * 1024 * 1024)

    if kb == 1:
        kernel = _loras_nt_single_kernel
        scratch = []
    else:
        kernel = _loras_nt_acc_kernel
        scratch = [pltpu.VMEM((tm, tn), jnp.float32)]

    y_p = pl.pallas_call(
        kernel,
        out_shape=jax.ShapeDtypeStruct((Mp, Np), out_dtype),
        grid_spec=pltpu.PrefetchScalarGridSpec(
            num_scalar_prefetch=0,
            grid=grid,
            in_specs=[
                pl.BlockSpec((tm, tk), lambda i, j, k: (i, k)),   # x tile
                pl.BlockSpec((tn, tk), lambda i, j, k: (j, k)),   # fused W (out,in)
                pl.BlockSpec((1, tn), lambda i, j, k: (0, j)),    # bias tile
            ],
            out_specs=pl.BlockSpec((tm, tn), lambda i, j, k: (i, j)),
            scratch_shapes=scratch,
        ),
        compiler_params=pltpu.CompilerParams(**cp_kwargs),
        cost_estimate=cost,
    )(x_p, w_p, b_p)

    return y_p[:M, :out_feature].reshape(B, L, out_feature)


# ---------------------------------------------------------------------------
# Reference + test harness
# ---------------------------------------------------------------------------
def _reference(x, right_w, left_w, sparse_w, bias):
    hp = lax.Precision.HIGHEST
    lrx = jnp.einsum("bli,ri->blr", x, right_w, precision=hp)
    lrx = jnp.einsum("blr,or->blo", lrx, left_w, precision=hp)
    y = lrx
    if sparse_w is not None:
        y = y + jnp.einsum("bli,oi->blo", x, sparse_w, precision=hp)
    if bias is not None:
        y = y + bias
    return y


def _make_inputs(key, B, L, in_feature, out_feature, rank):
    kx, kr, kl, ks, _ = jax.random.split(key, 5)
    x = jax.random.normal(kx, (B, L, in_feature), dtype=jnp.float32)
    # nn.Linear-style uniform(-1/sqrt(fan_in), 1/sqrt(fan_in)) init, deterministic.
    right_w = jax.random.uniform(kr, (rank, in_feature), jnp.float32,
                                 -1.0 / in_feature ** 0.5, 1.0 / in_feature ** 0.5)
    left_w = jax.random.uniform(kl, (out_feature, rank), jnp.float32,
                                -1.0 / rank ** 0.5, 1.0 / rank ** 0.5)
    sparse_w = jax.random.uniform(ks, (out_feature, in_feature), jnp.float32,
                                  -1.0 / in_feature ** 0.5, 1.0 / in_feature ** 0.5)
    bias = jnp.zeros((out_feature,), dtype=jnp.float32)  # PyTorch __init__ zeros
    return x, right_w, left_w, sparse_w, bias


if __name__ == "__main__":
    key = jax.random.PRNGKey(0)
    k1, k2 = jax.random.split(key)

    # --- small test: single-tile grid, f32 compute -> tight tolerance ---------
    B, L, in_f, out_f, rank = 2, 8, 32, 32, 8
    x, rw, lw, sw, b = _make_inputs(k1, B, L, in_f, out_f, rank)
    y = linear_loras_forward(x, rw, lw, sw, b, compute_dtype=jnp.float32)
    jax.block_until_ready(y)
    y_ref = _reference(x, rw, lw, sw, b)
    assert y.shape == (B, L, out_f)
    assert jnp.allclose(y, y_ref, atol=1e-5, rtol=1e-5), "mismatch (small, f32)"

    # --- larger test: default bf16 compute, no padding waste, M split for MC --
    B, L, in_f, out_f, rank = 2, 160, 640, 384, 8
    x, rw, lw, sw, b = _make_inputs(k2, B, L, in_f, out_f, rank)
    y = linear_loras_forward(x, rw, lw, sw, b)                 # bf16 operands
    jax.block_until_ready(y)
    y_ref = _reference(x, rw, lw, sw, b)
    assert y.shape == (B, L, out_f)
    assert jnp.allclose(y, y_ref, atol=3e-2, rtol=3e-2), "mismatch (bf16)"

    # --- pre-fused (cached) weight path must match the on-the-fly path --------
    wf = fuse_loras_weight(rw, lw, sw)                         # hoisted/cached
    y_pre = linear_loras_forward(x, bias=b, fused_w=wf)
    jax.block_until_ready(y_pre)
    assert jnp.array_equal(y, y_pre), "prefused path mismatch"

    # --- multi-K-step accumulator path (small tk forces K grid > 1), f32 ------
    y_acc = linear_loras_forward(x, rw, lw, sw, b, tk=256,
                                 compute_dtype=jnp.float32)
    jax.block_until_ready(y_acc)
    assert jnp.allclose(y_acc, y_ref, atol=1e-4, rtol=1e-4), "mismatch (K acc)"

    print("KERNEL_OK")
</pallas_src>

<mosaic_0001>
module attributes {stable_mosaic.version = 11 : i64} {
  func.func @_loras_nt_single_kernel(%arg0: i32, %arg1: i32, %arg2: i32, %arg3: memref<16x128xf32, #tpu.memory_space<vmem>>, %arg4: memref<128x128xf32, #tpu.memory_space<vmem>>, %arg5: memref<1x128xf32, #tpu.memory_space<vmem>>, %arg6: memref<16x128xf32, #tpu.memory_space<vmem>>) attributes {dimension_semantics = [#tpu.dimension_semantics<parallel>, #tpu.dimension_semantics<parallel>, #tpu.dimension_semantics<arbitrary>], iteration_bounds = array<i64: 1, 1, 1>, scalar_prefetch = 0 : i64, scratch_operands = 0 : i64, tpu.core_type = #tpu.core_type<tc>, window_params = [{transform_indices = @transform_0, window_bounds = array<i64: 16, 128>}, {transform_indices = @transform_1, window_bounds = array<i64: 128, 128>}, {transform_indices = @transform_2, window_bounds = array<i64: 1, 128>}, {transform_indices = @transform_3, window_bounds = array<i64: 16, 128>}]} {
    %c0 = arith.constant 0 : index
    %c0_0 = arith.constant 0 : index
    %0 = vector.load %arg3[%c0, %c0_0] : memref<16x128xf32, #tpu.memory_space<vmem>>, vector<16x128xf32>
    %c0_1 = arith.constant 0 : index
    %c0_2 = arith.constant 0 : index
    %1 = vector.load %arg4[%c0_1, %c0_2] : memref<128x128xf32, #tpu.memory_space<vmem>>, vector<128x128xf32>
    %cst = arith.constant dense<0.000000e+00> : vector<16x128xf32>
    %2 = tpu.matmul %0, %1, %cst {dimension_numbers = #tpu.dot_dimension_numbers<[1], [1], [0], [0], [0, 0, 1, 0], [], []>} : vector<16x128xf32>, vector<128x128xf32>, vector<16x128xf32> -> vector<16x128xf32>
    %c0_3 = arith.constant 0 : index
    %c0_4 = arith.constant 0 : index
    %3 = vector.load %arg5[%c0_3, %c0_4] : memref<1x128xf32, #tpu.memory_space<vmem>>, vector<1x128xf32>
    %4 = vector.broadcast %3 : vector<1x128xf32> to vector<16x128xf32>
    %5 = arith.addf %2, %4 : vector<16x128xf32>
    %c0_5 = arith.constant 0 : index
    %c0_6 = arith.constant 0 : index
    %6 = vector.load %arg6[%c0_5, %c0_6] : memref<16x128xf32, #tpu.memory_space<vmem>>, vector<16x128xf32>
    tpu.vector_store %arg6[%c0_5, %c0_6], %5 {strides = array<i32>} : memref<16x128xf32, #tpu.memory_space<vmem>>, vector<16x128xf32>,
    return
  }
  func.func @transform_0(%arg0: i32, %arg1: i32, %arg2: i32) -> (i32, i32) {
    %c0_i32 = arith.constant 0 : i32
    return %arg0, %arg2 : i32, i32
  }
  func.func @transform_1(%arg0: i32, %arg1: i32, %arg2: i32) -> (i32, i32) {
    %c0_i32 = arith.constant 0 : i32
    return %arg1, %arg2 : i32, i32
  }
  func.func @transform_2(%arg0: i32, %arg1: i32, %arg2: i32) -> (i32, i32) {
    %c0_i32 = arith.constant 0 : i32
    %c0_i32_0 = arith.constant 0 : i32
    return %c0_i32, %arg1 : i32, i32
  }
  func.func @transform_3(%arg0: i32, %arg1: i32, %arg2: i32) -> (i32, i32) {
    %c0_i32 = arith.constant 0 : i32
    return %arg0, %arg1 : i32, i32
  }
}

</mosaic_0001>

<bundles_post_ra>
// kernel: tpu_custom_call.1
= control target key start
LH: loop header
LB: loop body
LE: loop exit
PB: predicated region body
PF: predicated region fallthrough
CT: control target
= control target key end

     0   :  { %8 = vsyncpa [#allocation3], 0  ;;  %s399_s0 = inlined_call_operand.hbm [shape: f32[16,128], index: 0, kind: input, shape index: {}]   ;;  %s400_s1 = inlined_call_operand.hbm [shape: f32[128,128], index: 1, kind: input, shape index: {}]   ;;  %s401_s2 = inlined_call_operand.vmem [shape: f32[1,128], index: 2, kind: input, shape index: {}]   ;;  %s402_s3 = inlined_call_operand.hbm [shape: f32[16,128], index: 3, kind: output, shape index: {}]  }
   0x1   :  { %9 = vsyncpa [#allocation6], 0 }
   0x2   :  { %10 = vsyncpa [#allocation4], 0  ;;  %s326_s12 = smov [#allocation2]   ;;  %s254_s16 = scalar_lea.hbm %s399_s0, 256 }
   0x3   :  { %s16_s13 = sshll.u32 %s326_s12, 4  ;;  %p255_p0 = scmp.ne.s32.totalorder %s399_s0, %s254_s16  ;;  %s17_s13 = int_to_ptr.vmem [resolvable:$true] %s16_s13 }
   0x4   :  { %p258_p1 = scmp.lt.u32.totalorder %s254_s16, %s399_s0 }
   0x6   :  { %p260_p2 = pnand %p258_p1, %p255_p0 }
   0x8   :  { %263 = shalt.err (!%p260_p2)
}
   0x9   :  { %s264_s21 = scalar_lea.vmem %s17_s13, 256  ;;  %p269_p4 = scmp.lt.s32.totalorder %s17_s13, %s17_s13 }
   0xa   :  { %p265_p3 = scmp.ne.s32.totalorder %s17_s13, %s264_s21  ;;  %p270_p5 = scmp.lt.s32.totalorder %s264_s21, %s264_s21 }
   0xc   :  { %p271_p6 = por %p270_p5, %p269_p4 }
   0xe   :  { %p272_p7 = pnand %p271_p6, %p265_p3 }
  0x10   :  { %275 = shalt.err (!%p272_p7)
}
  0x11   :  { %s327_s22 = smov 128   ;;  %s328_s23 = smov 8  }
  0x12   :  { %22 = dma.hbm_to_vmem [thread:$0]  %s399_s0, 256, %s17_s13, [#allocation3], %s327_s22, %s327_s22, %s328_s23  }
  0x13   :  { %s329_s26 = smov [#allocation5]   ;;  %s276_s30 = scalar_lea.hbm %s400_s1, 2048 }
  0x14   :  { %s28_s27 = sshll.u32 %s329_s26, 4  ;;  %p277_p8 = scmp.ne.s32.totalorder %s400_s1, %s276_s30  ;;  %s29_s27 = int_to_ptr.vmem [resolvable:$true] %s28_s27 }
  0x15   :  { %p280_p9 = scmp.lt.u32.totalorder %s276_s30, %s400_s1 }
  0x17   :  { %p282_p10 = pnand %p280_p9, %p277_p8 }
  0x19   :  { %285 = shalt.err (!%p282_p10)
}
  0x1a   :  { %s286_s8 = scalar_lea.vmem %s29_s27, 2048  ;;  %p291_p12 = scmp.lt.s32.totalorder %s29_s27, %s29_s27 }
  0x1b   :  { %p287_p11 = scmp.ne.s32.totalorder %s29_s27, %s286_s8  ;;  %p292_p13 = scmp.lt.s32.totalorder %s286_s8, %s286_s8 }
  0x1d   :  { %p293_p0 = por %p292_p13, %p291_p12 }
  0x1f   :  { %p294_p1 = pnand %p293_p0, %p287_p11 }
  0x21   :  { %297 = shalt.err (!%p294_p1)
}
  0x22   :  { %34 = dma.hbm_to_vmem [thread:$0]  %s400_s1, 2048, %s29_s27, [#allocation6], %s327_s22, %s327_s22, %s328_s23  }
  0x23   :  { %320 = dma.done.wait [#allocation3], 256  }
  0x24   :  { %321 = vsyncadd [#allocation3], 4294967040 }
  0x25   :  { %322 = dma.done.wait [#allocation6], 2048  }
  0x26   :  { %323 = vsyncadd [#allocation6], 4294965248  ;;  %v45_v0 = vld [vmem:[#allocation5] sm:$0xff]  ;;  %v46_v1 = vld [vmem:[#allocation5 + $0x8] sm:$0xff]  ;;  %s330_s11 = smov [#allocation7]  }
  0x27   :  { %v47_v2 = vld [vmem:[#allocation5 + $0x10] sm:$0xff]  ;;  %v217_v3 = vpack.c.bf16 %v46_v1, %v45_v0  ;;  %v48_v4 = vld [vmem:[#allocation5 + $0x18] sm:$0xff]  ;;  %v49_v7 = vld [vmem:[#allocation5 + $0x20] sm:$0xff]  ;;  %s150_s12 = sshll.u32 %s330_s11, 4  ;;  %s151_s12 = int_to_ptr.vmem [resolvable:$true] %s150_s12 }
  0x28   :  { %v221_v5 = vpack.c.bf16 %v48_v4, %v47_v2  ;;  %v43_v6 = vld [vmem:[#allocation2] sm:$0xff]  ;;  %v50_v8 = vld [vmem:[#allocation5 + $0x28] sm:$0xff]  ;;  %v52_v11 = vld [vmem:[#allocation5 + $0x38] sm:$0xff]  ;;  %s298_s13 = scalar_lea.vmem %s151_s12, 256  ;;  %p303_p3 = scmp.lt.s32.totalorder %s151_s12, %s151_s12 }
  0x29   :  { %218 = vmatprep.subr.bf16.mxu0 %v217_v3  ;;  %214 = vmatprep.mubr.f32.mxu0 %v43_v6  ;;  %v225_v9 = vpack.c.bf16 %v50_v8, %v49_v7  ;;  %v51_v10 = vld [vmem:[#allocation5 + $0x30] sm:$0xff]  ;;  %v53_v13 = vld [vmem:[#allocation5 + $0x40] sm:$0xff]  ;;  %v54_v14 = vld [vmem:[#allocation5 + $0x48] sm:$0xff]  ;;  %p299_p2 = scmp.ne.s32.totalorder %s151_s12, %s298_s13  ;;  %p304_p4 = scmp.lt.s32.totalorder %s298_s13, %s298_s13 }
  0x2a   :  { %220 = vmatpush3.bf16.xpose.msra.mxu0 %v217_v3  ;;  %v229_v12 = vpack.c.bf16 %v52_v11, %v51_v10  ;;  %v233_v15 = vpack.c.bf16 %v54_v14, %v53_v13  ;;  %v55_v16 = vld [vmem:[#allocation5 + $0x50] sm:$0xff]  ;;  %v56_v17 = vld [vmem:[#allocation5 + $0x58] sm:$0xff]  ;;  %v57_v19 = vld [vmem:[#allocation5 + $0x60] sm:$0xff] }
  0x2b   :  { %222 = vmatprep.subr.bf16.mxu0 %v221_v5  ;;  %v237_v18 = vpack.c.bf16 %v56_v17, %v55_v16  ;;  %v58_v20 = vld [vmem:[#allocation5 + $0x68] sm:$0xff]  ;;  %v59_v22 = vld [vmem:[#allocation5 + $0x70] sm:$0xff]  ;;  %v60_v23 = vld [vmem:[#allocation5 + $0x78] sm:$0xff]  ;;  %p305_p5 = por %p304_p4, %p303_p3 }
  0x2c   :  { %v241_v21 = vpack.c.bf16 %v58_v20, %v57_v19  ;;  %v245_v24 = vpack.c.bf16 %v60_v23, %v59_v22  ;;  %v44_v25 = vld [vmem:[#allocation2 + $0x8] sm:$0xff]  ;;  %v163_v26 = vld [vmem:[%s401_s2] ss:$0 sm:$0xff] }
  0x2d   :  { %p306_p6 = pnand %p305_p5, %p299_p2 }
  0x32   :  { %224 = vmatpush3.bf16.xpose.msra.mxu0 %v221_v5 }
  0x33   :  { %226 = vmatprep.subr.bf16.mxu0 %v225_v9 }
  0x3a   :  { %228 = vmatpush3.bf16.xpose.msra.mxu0 %v225_v9 }
  0x3b   :  { %230 = vmatprep.subr.bf16.mxu0 %v229_v12 }
  0x42   :  { %232 = vmatpush3.bf16.xpose.msra.mxu0 %v229_v12 }
  0x43   :  { %234 = vmatprep.subr.bf16.mxu0 %v233_v15 }
  0x4a   :  { %236 = vmatpush3.bf16.xpose.msra.mxu0 %v233_v15 }
  0x4b   :  { %238 = vmatprep.subr.bf16.mxu0 %v237_v18 }
  0x52   :  { %240 = vmatpush3.bf16.xpose.msra.mxu0 %v237_v18 }
  0x53   :  { %242 = vmatprep.subr.bf16.mxu0 %v241_v21 }
  0x5a   :  { %244 = vmatpush3.bf16.xpose.msra.mxu0 %v241_v21 }
  0x5b   :  { %246 = vmatprep.subr.bf16.mxu0 %v245_v24 }
  0x62   :  { %248 = vmatpush3.bf16.xpose.msra.mxu0 %v245_v24 }
  0x69   :  { %215 = vmatmul.mubr.f32.vlgmr.msra.gmra.mrb[0].mxu0 %v44_v25 }
 0x13c   :  { %v216_v27 = vpop.f32.mrb[0].mxu0 }
 0x13d   :  { %v140_v28 = vadd.f32 %v216_v27, %v163_v26  ;;  %v134_v29 = vpop.f32.mrb[1].mxu0 }
 0x13e   :  { %v135_v30 = vadd.f32 %v163_v26, %v134_v29 }
 0x13f   :  { %144 = vst [vmem:[#allocation7 + $0x8] sm:$0xff] %v140_v28 }
 0x140   :  { %143 = vst [vmem:[#allocation7] sm:$0xff] %v135_v30 }
 0x141   :  { %309 = shalt.err (!%p306_p6)
}
 0x142   :  { %s310_s2 = scalar_lea.hbm %s402_s3, 256 }
 0x143   :  { %p311_p7 = scmp.ne.s32.totalorder %s402_s3, %s310_s2  ;;  %p314_p8 = scmp.lt.u32.totalorder %s310_s2, %s402_s3 }
 0x145   :  { %p316_p9 = pnand %p314_p8, %p311_p7 }
 0x147   :  { %319 = shalt.err (!%p316_p9)
}
 0x148   :  { %156 = dma.vmem_to_hbm [thread:$0]  %s151_s12, 256, %s402_s3, [#allocation4], %s327_s22, %s327_s22, %s328_s23  }
 0x149   :  { %324 = dma.done.wait [#allocation4], 256  }
 0x14a   :  { %325 = vsyncadd [#allocation4], 4294967040 }
 0x14b   :  { %160 = vsyncpa [#allocation3], 1 }
 0x14c   :  { %161 = vsyncpa [#allocation6], 1 }
 0x14d   :  { %162 = vsyncpa [#allocation4], 1 }

</bundles_post_ra>
